<compile_context>
chip_gen: v7x
topology: tpu7x:2x2x1
jax: 0.10.0
libtpu: 0.0.40
codegen_flags: <defaults>
</compile_context>

<pallas_src>
import jax
import jax.numpy as jnp
from jax.experimental import pallas as pl
from jax.experimental.pallas import tpu as pltpu


def xor_mlp_kernel(xT_ref, w1_ref, b1_ref, w2_ref, b2_ref, oT_ref):
    # Shapes (per grid step):
    #   xT_ref : (in_dim, TB)      input, batch on lanes
    #   w1_ref : (hidden, in_dim)  PyTorch layout, resident
    #   b1_ref : (hidden, 1)
    #   w2_ref : (hidden, out_dim)
    #   b2_ref : (out_dim, 1)      SMEM scalars
    #   oT_ref : (out_dim, TB)     lane-dense output
    xT = xT_ref[...]
    w1 = w1_ref[...]
    in_dim = xT.shape[0]
    out_dim = oT_ref.shape[0]

    # ---- Layer 1: h = tanh(W1 @ x + b1), K == in_dim (tiny) -> VPU broadcast FMAs.
    h = b1_ref[...]  # (hidden, 1), broadcasts up on first add
    for k in range(in_dim):  # static, tiny
        h = h + w1[:, k:k + 1] * xT[k:k + 1, :]  # (hidden,1)*(1,TB) -> (hidden,TB)
    h = jnp.tanh(h)

    # ---- Layer 2: y = tanh(W2 @ h + b2) via VPU multiply + sublane reduce (XLU).
    w2 = w2_ref[...]
    rows = []
    for j in range(out_dim):  # static, out_dim == 1 for this module
        yj = jnp.sum(w2[:, j:j + 1] * h, axis=0, keepdims=True) + b2_ref[j, 0]
        rows.append(yj)
    y = rows[0] if out_dim == 1 else jnp.concatenate(rows, axis=0)

    oT_ref[...] = jnp.tanh(y).astype(oT_ref.dtype)


def xor_forward(x, w1, b1, w2, b2, *, tb_max=1024):
    """x: (batch, in_dim); weights in PyTorch layout: w1 (H, in), b1 (H,),
    w2 (out, H), b2 (out,). Returns (batch, out)."""
    batch, in_dim = x.shape
    hidden = w1.shape[0]
    out_dim = w2.shape[0]

    # Batch tile: multiple of 128 (lane width), capped at tb_max.
    tb = min(tb_max, 128 * pl.cdiv(batch, 128))
    padded = tb * pl.cdiv(batch, tb)

    # Feature-major inputs: batch on the lane axis.
    xT = x.T  # (in_dim, batch)
    if padded != batch:
        xT = jnp.pad(xT, ((0, 0), (0, padded - batch)))
    b1_col = b1.reshape(hidden, 1)
    w2_col = w2.T.reshape(hidden, out_dim)
    b2_col = b2.reshape(out_dim, 1)

    oT = pl.pallas_call(
        xor_mlp_kernel,
        out_shape=jax.ShapeDtypeStruct((out_dim, padded), jnp.float32),
        grid_spec=pl.GridSpec(
            grid=(padded // tb,),
            in_specs=[
                pl.BlockSpec((in_dim, tb), lambda i: (0, i)),        # xT: tiled on batch
                pl.BlockSpec((hidden, in_dim), lambda i: (0, 0)),    # w1: resident
                pl.BlockSpec((hidden, 1), lambda i: (0, 0)),         # b1: resident
                pl.BlockSpec((hidden, out_dim), lambda i: (0, 0)),   # w2: resident
                pl.BlockSpec(memory_space=pltpu.MemorySpace.SMEM),   # b2: scalar in SMEM
            ],
            out_specs=pl.BlockSpec((out_dim, tb), lambda i: (0, i)),  # lane-dense output
        ),
        compiler_params=pltpu.CompilerParams(
            dimension_semantics=("parallel",),  # megacore-shard batch on v7x
        ),
    )(xT, w1, b1_col, w2_col, b2_col)

    return oT[:, :batch].T  # (batch, out_dim)


def init_params(key, input_dim=2, hidden_dim=10, output_dim=1):
    # PyTorch nn.Linear default init: U(-1/sqrt(fan_in), 1/sqrt(fan_in)), PyTorch layout.
    k1, k2, k3, k4 = jax.random.split(key, 4)
    bound1 = 1.0 / jnp.sqrt(input_dim)
    bound2 = 1.0 / jnp.sqrt(hidden_dim)
    w1 = jax.random.uniform(k1, (hidden_dim, input_dim), jnp.float32, -bound1, bound1)
    b1 = jax.random.uniform(k2, (hidden_dim,), jnp.float32, -bound1, bound1)
    w2 = jax.random.uniform(k3, (output_dim, hidden_dim), jnp.float32, -bound2, bound2)
    b2 = jax.random.uniform(k4, (output_dim,), jnp.float32, -bound2, bound2)
    return w1, b1, w2, b2


if __name__ == "__main__":
    key = jax.random.PRNGKey(0)
    kx, kp, kx2 = jax.random.split(key, 3)

    input_dim, hidden_dim, output_dim = 2, 10, 1
    w1, b1, w2, b2 = init_params(kp, input_dim, hidden_dim, output_dim)

    def ref_fwd(x):
        return jnp.tanh(jnp.tanh(x @ w1.T + b1) @ w2.T + b2)

    # Small XOR truth-table batch (module-scale check).
    base = jnp.array([[0, 0], [0, 1], [1, 0], [1, 1]], jnp.float32)
    x_small = jnp.tile(base, (2, 1)) + 0.01 * jax.random.normal(kx, (8, input_dim))
    out_small = xor_forward(x_small, w1, b1, w2, b2)
    jax.block_until_ready(out_small)
    assert out_small.shape == (8, output_dim)
    assert jnp.allclose(out_small, ref_fwd(x_small), atol=1e-5), "small-batch mismatch"

    # Larger batch that is not a tile multiple: exercises batch tiling + padding.
    x_big = jax.random.normal(kx2, (2560, input_dim), dtype=jnp.float32)
    out_big = xor_forward(x_big, w1, b1, w2, b2)
    jax.block_until_ready(out_big)
    assert out_big.shape == (2560, output_dim)
    assert jnp.allclose(out_big, ref_fwd(x_big), atol=1e-5), "big-batch mismatch"

    print("KERNEL_OK")
</pallas_src>

<mosaic_0001>
module attributes {stable_mosaic.version = 11 : i64} {
  func.func @xor_mlp_kernel(%arg0: i32, %arg1: memref<2x128xf32, #tpu.memory_space<vmem>>, %arg2: memref<10x2xf32, #tpu.memory_space<vmem>>, %arg3: memref<10x1xf32, #tpu.memory_space<vmem>>, %arg4: memref<10x1xf32, #tpu.memory_space<vmem>>, %arg5: memref<1x1xf32, #tpu.memory_space<smem>>, %arg6: memref<1x128xf32, #tpu.memory_space<vmem>>) attributes {dimension_semantics = [#tpu.dimension_semantics<parallel>], iteration_bounds = array<i64: 1>, scalar_prefetch = 0 : i64, scratch_operands = 0 : i64, tpu.core_type = #tpu.core_type<tc>, window_params = [{transform_indices = @transform_0, window_bounds = array<i64: 2, 128>}, {pipeline_mode = #tpu.pipeline_mode<synchronous>, transform_indices = @transform_1, window_bounds = array<i64: 10, 2>}, {pipeline_mode = #tpu.pipeline_mode<synchronous>, transform_indices = @transform_2, window_bounds = array<i64: 10, 1>}, {pipeline_mode = #tpu.pipeline_mode<synchronous>, transform_indices = @transform_3, window_bounds = array<i64: 10, 1>}, {transform_indices = @transform_4, window_bounds = array<i64: 1, 1>}, {transform_indices = @transform_5, window_bounds = array<i64: 1, 128>}]} {
    %c0 = arith.constant 0 : index
    %c0_0 = arith.constant 0 : index
    %0 = vector.load %arg1[%c0, %c0_0] : memref<2x128xf32, #tpu.memory_space<vmem>>, vector<2x128xf32>
    %c0_1 = arith.constant 0 : index
    %c0_2 = arith.constant 0 : index
    %1 = vector.load %arg2[%c0_1, %c0_2] : memref<10x2xf32, #tpu.memory_space<vmem>>, vector<10x2xf32>
    %c0_3 = arith.constant 0 : index
    %c0_4 = arith.constant 0 : index
    %2 = vector.load %arg3[%c0_3, %c0_4] : memref<10x1xf32, #tpu.memory_space<vmem>>, vector<10x1xf32>
    %3 = vector.extract_strided_slice %1 {offsets = [0, 0], sizes = [10, 1], strides = [1, 1]} : vector<10x2xf32> to vector<10x1xf32>
    %4 = vector.extract_strided_slice %0 {offsets = [0, 0], sizes = [1, 128], strides = [1, 1]} : vector<2x128xf32> to vector<1x128xf32>
    %5 = vector.broadcast %3 : vector<10x1xf32> to vector<10x128xf32>
    %6 = vector.broadcast %4 : vector<1x128xf32> to vector<10x128xf32>
    %7 = arith.mulf %5, %6 : vector<10x128xf32>
    %8 = vector.broadcast %2 : vector<10x1xf32> to vector<10x128xf32>
    %9 = arith.addf %8, %7 : vector<10x128xf32>
    %10 = vector.extract_strided_slice %1 {offsets = [0, 1], sizes = [10, 1], strides = [1, 1]} : vector<10x2xf32> to vector<10x1xf32>
    %11 = vector.extract_strided_slice %0 {offsets = [1, 0], sizes = [1, 128], strides = [1, 1]} : vector<2x128xf32> to vector<1x128xf32>
    %12 = vector.broadcast %10 : vector<10x1xf32> to vector<10x128xf32>
    %13 = vector.broadcast %11 : vector<1x128xf32> to vector<10x128xf32>
    %14 = arith.mulf %12, %13 : vector<10x128xf32>
    %15 = arith.addf %9, %14 : vector<10x128xf32>
    %16 = math.tanh %15 : vector<10x128xf32>
    %c0_5 = arith.constant 0 : index
    %c0_6 = arith.constant 0 : index
    %17 = vector.load %arg4[%c0_5, %c0_6] : memref<10x1xf32, #tpu.memory_space<vmem>>, vector<10x1xf32>
    %18 = vector.broadcast %17 : vector<10x1xf32> to vector<10x128xf32>
    %19 = arith.mulf %18, %16 : vector<10x128xf32>
    %cst = arith.constant dense<0.000000e+00> : vector<128xf32>
    %20 = vector.multi_reduction <add>, %19, %cst [0] : vector<10x128xf32> to vector<128xf32>
    %21 = vector.shape_cast %20 : vector<128xf32> to vector<1x128xf32>
    %c0_7 = arith.constant 0 : index
    %c0_8 = arith.constant 0 : index
    %22 = memref.load %arg5[%c0_7, %c0_8] : memref<1x1xf32, #tpu.memory_space<smem>>
    %23 = vector.broadcast %22 : f32 to vector<1x128xf32>
    %24 = arith.addf %21, %23 : vector<1x128xf32>
    %25 = math.tanh %24 : vector<1x128xf32>
    %c0_9 = arith.constant 0 : index
    %c0_10 = arith.constant 0 : index
    %26 = vector.load %arg6[%c0_9, %c0_10] : memref<1x128xf32, #tpu.memory_space<vmem>>, vector<1x128xf32>
    tpu.vector_store %arg6[%c0_9, %c0_10], %25 {strides = array<i32>} : memref<1x128xf32, #tpu.memory_space<vmem>>, vector<1x128xf32>,
    return
  }
  func.func @transform_0(%arg0: i32) -> (i32, i32) {
    %c0_i32 = arith.constant 0 : i32
    %c0_i32_0 = arith.constant 0 : i32
    return %c0_i32, %arg0 : i32, i32
  }
  func.func @transform_1(%arg0: i32) -> (i32, i32) {
    %c0_i32 = arith.constant 0 : i32
    %c0_i32_0 = arith.constant 0 : i32
    %c0_i32_1 = arith.constant 0 : i32
    return %c0_i32, %c0_i32_0 : i32, i32
  }
  func.func @transform_2(%arg0: i32) -> (i32, i32) {
    %c0_i32 = arith.constant 0 : i32
    %c0_i32_0 = arith.constant 0 : i32
    %c0_i32_1 = arith.constant 0 : i32
    return %c0_i32, %c0_i32_0 : i32, i32
  }
  func.func @transform_3(%arg0: i32) -> (i32, i32) {
    %c0_i32 = arith.constant 0 : i32
    %c0_i32_0 = arith.constant 0 : i32
    %c0_i32_1 = arith.constant 0 : i32
    return %c0_i32, %c0_i32_0 : i32, i32
  }
  func.func @transform_4(%arg0: i32) -> (i32, i32) {
    %c0_i32 = arith.constant 0 : i32
    %c0_i32_0 = arith.constant 0 : i32
    %c0_i32_1 = arith.constant 0 : i32
    return %c0_i32, %c0_i32_0 : i32, i32
  }
  func.func @transform_5(%arg0: i32) -> (i32, i32) {
    %c0_i32 = arith.constant 0 : i32
    %c0_i32_0 = arith.constant 0 : i32
    return %c0_i32, %arg0 : i32, i32
  }
}

</mosaic_0001>

<bundles_post_ra>
// kernel: tpu_custom_call.1
= control target key start
LH: loop header
LB: loop body
LE: loop exit
PB: predicated region body
PF: predicated region fallthrough
CT: control target
= control target key end

     0   :  { %v152_v2 = vmov 0   ;;  %s221_s0 = inlined_call_operand.vmem [shape: f32[2,128], index: 0, kind: input, shape index: {}]   ;;  %s222_s1 = inlined_call_operand.vmem [shape: f32[10,2], index: 1, kind: input, shape index: {}]   ;;  %s223_s2 = inlined_call_operand.vmem [shape: f32[10,1], index: 2, kind: input, shape index: {}]   ;;  %s224_s3 = inlined_call_operand.vmem [shape: f32[10,1], index: 3, kind: input, shape index: {}]   ;;  %s225_s4 = inlined_call_operand.<no memory space> [shape: f32[1,1], index: 4, kind: input, shape index: {}]   ;;  %s226_s5 = inlined_call_operand.hbm [shape: f32[1,128], index: 5, kind: output, shape index: {}]  }
   0x1   :  { %v26_v0 = vld [vmem:[%s223_s2 + $0x8] sm:$0x3]  ;;  %119 = vset.pattern.permute.xlu1 %v152_v2  ;;  %118 = vset.pattern.permute.xlu0 %v152_v2 }
   0x2   :  { %v24_v1 = vld [vmem:[%s222_s1 + $0x8] sm:$0x3]  ;;  %50 = vperm.xlu1 %119, %v26_v0  }
   0x3   :  { %34 = vperm.xlu0 %118, %v24_v1  }
   0x4   :  { %11 = vsyncpa [#allocation4], 0  ;;  %v23_v3 = vld [vmem:[%s222_s1] sm:$0xff]  ;;  %v153_v4 = vmov 1   ;;  %v74_v6 = vld [vmem:[%s224_s3 + $0x8] sm:$0x3]  ;;  %v37_v8 = vlaneseq  ;;  %v97_v42 = vstv %s225_s4 }
   0x5   :  { %v25_v5 = vld [vmem:[%s223_s2] sm:$0xff]  ;;  %vm87_vm0 = vcmask 1041408  }
   0x6   :  { %120 = vset.pattern.permute.xlu1 %v153_v4  ;;  %v73_v7 = vld [vmem:[%s224_s3] sm:$0xff]  ;;  %v38_v9 = vshrl.u32 %v37_v8, 7  ;;  %s154_s3 = smov [#allocation3]  }
   0x7   :  { %29 = vperm.xlu0 %118, %v23_v3   ;;  %60 = vperm.xlu1 %120, %v24_v1   ;;  %v22_v11 = vld [vmem:[%s221_s0] sm:$0x3]  ;;  %s107_s6 = sshll.u32 %s154_s3, 4  ;;  %s108_s6 = int_to_ptr.vmem [resolvable:$true] %s107_s6 }
   0x8   :  { %v39_v10 = vsub.s32 0, %v38_v9  ;;  %v65_v13 = vsub.s32 1, %v38_v9  ;;  %s128_s7 = scalar_lea.vmem %s108_s6, 16  ;;  %s132_s8 = scalar_lea.vmem %s108_s6, 32 }
   0x9   :  { %p129_p0 = scmp.ne.s32.totalorder %s108_s6, %s128_s7  ;;  %p133_p1 = scmp.lt.s32.totalorder %s108_s6, %s108_s6 }
   0xa   :  { %v40_v12 = vrot.slane %v22_v11, %v39_v10  ;;  %v66_v17 = vrot.slane %v22_v11, %v65_v13  ;;  %p134_p2 = scmp.lt.s32.totalorder %s132_s8, %s128_s7 }
   0xb   :  { %45 = vperm.xlu0 %118, %v25_v5   ;;  %56 = vperm.xlu1 %120, %v23_v3  }
   0xc   :  { %p135_p3 = por %p134_p2, %p133_p1 }
   0xe   :  { %p136_p4 = pnand %p135_p3, %p129_p0 }
   0xf   :  { %82 = vperm.xlu0 %118, %v74_v6   ;;  %121 = vset.pattern.permute.xlu1 %v152_v2 }
  0x10   :  { %77 = vperm.xlu1 %121, %v73_v7  }
  0x81   :  { %v51_v14 = vpop.permute.xlu1 %50 }
  0x82   :  { %v35_v15 = vpop.permute.xlu0 %34 }
  0x83   :  { %v42_v16 = vmul.f32 %v40_v12, %v35_v15 }
  0x85   :  { %v54_v20 = vadd.f32 %v51_v14, %v42_v16 }
  0x86   :  { %v30_v18 = vpop.permute.xlu0 %29  ;;  %v61_v19 = vpop.permute.xlu1 %60 }
  0x87   :  { %v68_v21 = vmul.f32 %v66_v17, %v61_v19  ;;  %v41_v22 = vmul.f32 %v40_v12, %v30_v18 }
  0x89   :  { %v70_v23 = vadd.f32 %v68_v21, %v54_v20 }
  0x8a   :  { %v46_v24 = vpop.permute.xlu0 %45  ;;  %v57_v26 = vpop.permute.xlu1 %56 }
  0x8b   :  { %v53_v25 = vadd.f32 %v46_v24, %v41_v22  ;;  %122 = vtanh.f32 %v70_v23  ;;  %v67_v27 = vmul.f32 %v66_v17, %v57_v26 }
  0x8d   :  { %v69_v28 = vadd.f32 %v67_v27, %v53_v25 }
  0x8e   :  { %v83_v30 = vpop.permute.xlu0 %82 }
  0x8f   :  { %124 = vtanh.f32 %v69_v28  ;;  %v78_v32 = vpop.permute.xlu1 %77 }
  0x95   :  { %v123_v29 = vpop.eup %122 }
  0x96   :  { %v86_v31 = vmul.f32 %v123_v29, %v83_v30 }
  0x98   :  { %v88_v35 = vsel %vm87_vm0, %v86_v31, 0.0 }
  0x99   :  { %v125_v33 = vpop.eup %124 }
  0x9a   :  { %v85_v34 = vmul.f32 %v125_v33, %v78_v32 }
  0x9c   :  { %v89_v36 = vadd.f32 %v88_v35, %v85_v34 }
  0x9e   :  { %v90_v37 = vrot.slane %v89_v36, 4 }
  0xa0   :  { %v91_v38 = vadd.f32 %v90_v37, %v89_v36 }
  0xa2   :  { %v92_v39 = vrot.slane %v91_v38, 2 }
  0xa4   :  { %v93_v40 = vadd.f32 %v92_v39, %v91_v38 }
  0xa6   :  { %v94_v41 = vrot.slane %v93_v40, 1 }
  0xa8   :  { %v95_v43 = vadd.f32 %v94_v41, %v93_v40 }
  0xaa   :  { %v98_v44 = vadd.f32 %v97_v42, %v95_v43 }
  0xac   :  { %126 = vtanh.f32 %v98_v44 }
  0xb6   :  { %v127_v45 = vpop.eup %126 }
  0xb7   :  { %100 = vst [vmem:[#allocation3] sm:$0x1] %v127_v45 }
  0xb8   :  { %139 = shalt.err (!%p136_p4)
}
  0xb9   :  { %s140_s4 = scalar_lea.hbm %s226_s5, 16 }
  0xba   :  { %p141_p5 = scmp.ne.s32.totalorder %s226_s5, %s140_s4  ;;  %p144_p6 = scmp.lt.u32.totalorder %s140_s4, %s226_s5 }
  0xbc   :  { %p146_p7 = pnand %p144_p6, %p141_p5 }
  0xbe   :  { %149 = shalt.err (!%p146_p7)
}
  0xbf   :  { %110 = dma.vmem_to_hbm [thread:$0]  %s108_s6, 16, %s226_s5, [#allocation4]  }
  0xc0   :  { %150 = dma.done.wait [#allocation4], 16  }
  0xc1   :  { %151 = vsyncadd [#allocation4], 4294967280 }
  0xc2   :  { %114 = vsyncpa [#allocation4], 1 }

</bundles_post_ra>
